<compile_context>
chip_gen: v5e
topology: v5e:2x2
jax: 0.10.0
libtpu: 0.0.40
codegen_flags: <defaults>
</compile_context>

<pallas_src>
import functools

import jax
import jax.numpy as jnp
from jax.experimental import pallas as pl
from jax.experimental.pallas import tpu as pltpu


# ----------------------------- Pallas kernel --------------------------------
def _conv3x3_kernel(x_ref, w_ref, b_ref, o_ref, slab_ref, *, C_in, W, TR):
    """3x3 stride-1 'same' conv, one (batch, row-tile) per grid step.

    x_ref   : (1, 1, C_in, (TR+3)*(W+2)) bf16  zero/halo-padded row tile, spatial flattened
                                               on lanes (1 row above, 2 rows below, 1 col
                                               left/right of the TR real rows).
    w_ref   : (C4, 9*C_in)               bf16  merged tap weights, K order = tap-major
                                               (t = 3*ky + kx), channel-minor.
    b_ref   : (C4, 1)                    f32
    o_ref   : (1, 1, C4, TR*(W+2))       bf16  output raster on the padded-width grid (the 2
                                               pad columns per row are garbage, dropped later).
    slab_ref: (9*C_in, TR*(W+2))         bf16  VMEM im2col slab, rebuilt once per step.
    """
    Wp = W + 2
    Mo = TR * Wp
    # Build the (9*C_in, Mo) tap slab once, then ONE K=9*C_in matmul.  The 3-row bottom
    # margin of the tile is what keeps the ky=2 slices in bounds (VMEM refs have no runtime
    # OOB check) -- do not shrink the padding.
    for t in range(9):                                   # static, unrolled: 9 taps
        start = (t // 3) * Wp + (t % 3)                  # static lane offset, tap (ky, kx)
        slab_ref[t * C_in:(t + 1) * C_in, :] = x_ref[0, 0, :, start:start + Mo]
    acc = jnp.dot(w_ref[...], slab_ref[...], preferred_element_type=jnp.float32)
    o_ref[0, 0] = (acc + b_ref[...]).astype(o_ref.dtype)  # f32 bias epilogue, bf16 writeback


def _conv3x3_phase_pallas(x, w4, bias4, *, row_tiles=None):
    """x: (N, C_in, H, W) f32; w4: (C4, C_in, 3, 3) f32; bias4: (C4,) f32
       -> (N, C4, H, W+2) bf16 conv raster (last 2 columns of every row are padding garbage)."""
    N, C_in, H, W = x.shape
    C4 = w4.shape[0]
    Wp = W + 2

    if row_tiles is None:
        # Batch >= 2 already feeds both v7x TensorCores; otherwise split the rows so a lone
        # image still uses both cores (neutral on single-TC v5e/v6e).
        row_tiles = 1 if N >= 2 else (2 if H % 2 == 0 else 1)
    if H % row_tiles != 0:
        row_tiles = 1
    TR = H // row_tiles
    Mo = TR * Wp
    Ftile = (TR + 3) * Wp

    # One small zero-pad + bf16 cast pass (1 top / 2 bottom / 1 left / 1 right); no 4x-sized
    # zero-stuffed or nearest-repeated intermediate ever hits HBM.
    xp = jnp.pad(x, ((0, 0), (0, 0), (1, 2), (1, 1))).astype(jnp.bfloat16)   # (N,C,H+3,Wp)
    if row_tiles == 1:
        xt = xp[:, None]                                                     # (N,1,C,H+3,Wp)
    else:
        # Per-tile halo copies (3 extra rows each) so all kernel tap slices stay static.
        xt = jnp.stack([xp[:, :, r * TR:r * TR + TR + 3] for r in range(row_tiles)], axis=1)
    xt = xt.reshape(N, row_tiles, C_in, Ftile)

    # Merged weights (C4, 9*C_in): K order = tap-major, channel-minor (matches slab build).
    w_m = w4.transpose(0, 2, 3, 1).reshape(C4, 9 * C_in).astype(jnp.bfloat16)
    b2 = bias4.astype(jnp.float32).reshape(C4, 1)

    # TODO(synk): for very large images also tile the W axis (halo columns) and re-derive the
    # tile size against v7x's 64 MiB VMEM; unnecessary at these shapes.
    out = pl.pallas_call(
        functools.partial(_conv3x3_kernel, C_in=C_in, W=W, TR=TR),
        out_shape=jax.ShapeDtypeStruct((N, row_tiles, C4, Mo), jnp.bfloat16),
        grid_spec=pltpu.PrefetchScalarGridSpec(
            num_scalar_prefetch=0,
            grid=(N, row_tiles),
            in_specs=[
                pl.BlockSpec((1, 1, C_in, Ftile), lambda n, r: (n, r, 0, 0)),  # one row tile
                pl.BlockSpec((C4, 9 * C_in), lambda n, r: (0, 0)),             # resident weights
                pl.BlockSpec((C4, 1), lambda n, r: (0, 0)),                    # resident bias
            ],
            out_specs=pl.BlockSpec((1, 1, C4, Mo), lambda n, r: (n, r, 0, 0)),
            scratch_shapes=[pltpu.VMEM((9 * C_in, Mo), jnp.bfloat16)],
        ),
        compiler_params=pltpu.CompilerParams(
            dimension_semantics=("parallel", "parallel"),
            vmem_limit_bytes=32 * 1024 * 1024,
        ),
    )(xt, w_m, b2)

    # (N, row_tiles, C4, TR*Wp) -> (N, C4, H, Wp); fused by XLA with the depth-to-space
    # transpose that follows (single HBM pass on the bf16 raster).
    out = out.reshape(N, row_tiles, C4, TR, Wp).transpose(0, 2, 1, 3, 4)
    return out.reshape(N, C4, H, Wp)


# --------------------- depth-to-space / phase-weight glue --------------------
def _depth_to_space2_depad(y, c_out, W):
    """y: (N, 4*c_out, H, W+2) bf16 conv raster (phase-major channels, 2 garbage pad cols per
    row) -> (N, c_out, 2H, 2W) f32.  Ordering matches the vunet DepthToSpace gist:
    out[n, co, 2r+s, 2c+j] = y[n, (2*s+j)*c_out + co, r, c]."""
    # TODO(synk): the channel->spatial interleave could be fused into the kernel's store with
    # in-kernel lane/sublane interleaves; kept as one fused XLA transpose pass for robustness.
    N, _, H, Wp = y.shape
    t = y.reshape(N, 2, 2, c_out, H, Wp)[..., :W]        # drop pad cols in the same pass
    t = t.transpose(0, 3, 4, 1, 5, 2)                    # (N, c_out, H, 2, W, 2)
    return t.reshape(N, c_out, 2 * H, 2 * W).astype(jnp.float32)


def _phase_expand(w, b, R):
    """w: (c_out, c_in, 3, 3) forward-oriented weight; R: (2, 3, 3) per-phase tap-combination
    matrix (identical for rows and cols).  Returns (4*c_out, c_in, 3, 3), (4*c_out,) such that
    conv3x3-same with them followed by DepthToSpace(2) reproduces the mode's 2x upsampling."""
    eff = jnp.einsum("syp,jxq,oipq->sjoiyx", R, R, w)     # (2, 2, c_out, c_in, 3, 3)
    w4 = eff.reshape(4 * w.shape[0], w.shape[1], 3, 3)    # channel (2s+j)*c_out + co
    b4 = jnp.tile(b, 4)
    return w4, b4


def _weight_norm_conv(params, w_norm):
    """MyConv2d: nn.Conv2d weight (C_out, C_in, k, k), weight_norm(dim=0)."""
    v, g, b = params["v"], params["g"], params["b"]
    if w_norm:
        norm = jnp.sqrt(jnp.sum(v * v, axis=(1, 2, 3), keepdims=True))
        w = g.reshape(-1, 1, 1, 1) * v / norm
    else:
        w = v
    return w, b


def _weight_norm_deconv(params, w_norm):
    """DeConv2d: nn.ConvTranspose2d weight (C_in, C_out, k, k), weight_norm(dim=1)."""
    v, g, b = params["v"], params["g"], params["b"]
    if w_norm:
        norm = jnp.sqrt(jnp.sum(v * v, axis=(0, 2, 3), keepdims=True))
        w = g.reshape(1, -1, 1, 1) * v / norm
    else:
        w = v
    return w, b


def upsample_forward(params, x, skip_in, *, mode, w_norm):
    """UpSample.forward: concat skip, then mode-specific 2x upsampling conv."""
    if skip_in is not None:
        x = jnp.concatenate([x, skip_in], axis=1)
    W = x.shape[-1]

    if mode == "subpixel":
        w4, b4 = _weight_norm_conv(params["depth4x"], w_norm)   # already 4*c_out phase channels
        c_out = w4.shape[0] // 4
    elif mode == "conv2d_t":
        # ConvTranspose2d(k=3, s=2, p=1, op=1): out[2y+s] phases -> s=0 uses tap k=1 at row y;
        # s=1 uses tap k=2 at row y and tap k=0 at row y+1 (same for columns).  No spatial flip.
        w_t, b = _weight_norm_deconv(params["up"], w_norm)
        w_f = jnp.transpose(w_t, (1, 0, 2, 3))                  # (c_out, c_in, 3, 3)
        R = jnp.array([[[0., 0., 0.], [0., 1., 0.], [0., 0., 0.]],
                       [[0., 0., 0.], [0., 0., 1.], [1., 0., 0.]]], jnp.float32)
        w4, b4 = _phase_expand(w_f, b, R)
        c_out = w_f.shape[0]
    elif mode == "nearest":
        # 3x3 conv after 2x nearest repeat collapses per phase: s=0 -> rows {y-1: w0, y: w1+w2};
        # s=1 -> rows {y: w0+w1, y+1: w2} (same for columns).
        w, b = _weight_norm_conv(params["conv"], w_norm)
        R = jnp.array([[[1., 0., 0.], [0., 1., 1.], [0., 0., 0.]],
                       [[0., 0., 0.], [1., 1., 0.], [0., 0., 1.]]], jnp.float32)
        w4, b4 = _phase_expand(w, b, R)
        c_out = w.shape[0]
    else:
        raise ValueError(f"Unknown mode: {mode}.")

    y = _conv3x3_phase_pallas(x, w4, b4)                        # (N, 4*c_out, H, W+2) bf16
    return _depth_to_space2_depad(y, c_out, W)                  # (N, c_out, 2H, 2W) f32


# ------------------------------ param init -----------------------------------
def _init_conv_params(key, c_in, c_out, k, w_norm):
    kv, kg, kb = jax.random.split(key, 3)
    v = jax.random.normal(kv, (c_out, c_in, k, k), jnp.float32) * 0.1
    g = (jax.random.uniform(kg, (c_out,), jnp.float32, 0.5, 1.5)
         if w_norm else jnp.ones((c_out,), jnp.float32))
    b = jax.random.normal(kb, (c_out,), jnp.float32) * 0.1
    return {"v": v, "g": g, "b": b}


def _init_deconv_params(key, c_in, c_out, k, w_norm):
    kv, kg, kb = jax.random.split(key, 3)
    v = jax.random.normal(kv, (c_in, c_out, k, k), jnp.float32) * 0.1
    g = (jax.random.uniform(kg, (c_out,), jnp.float32, 0.5, 1.5)
         if w_norm else jnp.ones((c_out,), jnp.float32))
    b = jax.random.normal(kb, (c_out,), jnp.float32) * 0.1
    return {"v": v, "g": g, "b": b}


def init_upsample_params(key, c_in, c_out, mode, w_norm):
    if mode == "subpixel":
        return {"depth4x": _init_conv_params(key, c_in, 4 * c_out, 3, w_norm)}
    if mode == "conv2d_t":
        return {"up": _init_deconv_params(key, c_in, c_out, 3, w_norm)}
    if mode == "nearest":
        return {"conv": _init_conv_params(key, c_in, c_out, 3, w_norm)}
    raise ValueError(mode)


# ------------------------------- references ----------------------------------
def _nearest_up2(x):
    return jnp.repeat(jnp.repeat(x, 2, axis=2), 2, axis=3)


def _deconv_as_fwd_weight(w_t):
    return jnp.flip(w_t, axis=(2, 3)).transpose(1, 0, 2, 3)


def _ref_conv3x3(x, w, b):
    out = jax.lax.conv_general_dilated(
        x, w, window_strides=(1, 1), padding=((1, 1), (1, 1)),
        dimension_numbers=("NCHW", "OIHW", "NCHW"))
    return out + b.reshape(1, -1, 1, 1)


def _ref_conv_transpose3x3_s2(x, w_t, b):
    # ConvTranspose2d(k=3, s=2, p=1, output_padding=1) == lhs-dilated conv with the flipped /
    # channel-swapped kernel and padding (k-1-p, k-1-p+op) = (1, 2).
    w = _deconv_as_fwd_weight(w_t)
    out = jax.lax.conv_general_dilated(
        x, w, window_strides=(1, 1), padding=((1, 2), (1, 2)),
        lhs_dilation=(2, 2), dimension_numbers=("NCHW", "OIHW", "NCHW"))
    return out + b.reshape(1, -1, 1, 1)


def _ref_depth_to_space2(x):
    # literal transcription of the torch gist used by DepthToSpace
    out = jnp.transpose(x, (0, 2, 3, 1))
    B, dH, dW, dD = out.shape
    sD = dD // 4
    t1 = out.reshape(B, dH, dW, 4, sD)
    spl = jnp.split(t1, 2, axis=3)
    stack = [t.reshape(B, dH, dW * 2, sD) for t in spl]
    out = jnp.stack(stack, 0)
    out = jnp.swapaxes(out, 0, 1)
    out = jnp.transpose(out, (0, 2, 1, 3, 4))
    out = out.reshape(B, dH * 2, dW * 2, sD)
    return jnp.transpose(out, (0, 3, 1, 2))


def _ref_upsample(params, x, skip_in, *, mode, w_norm):
    if skip_in is not None:
        x = jnp.concatenate([x, skip_in], axis=1)
    if mode == "subpixel":
        w, b = _weight_norm_conv(params["depth4x"], w_norm)
        return _ref_depth_to_space2(_ref_conv3x3(x, w, b))
    if mode == "conv2d_t":
        w_t, b = _weight_norm_deconv(params["up"], w_norm)
        return _ref_conv_transpose3x3_s2(x, w_t, b)
    if mode == "nearest":
        w, b = _weight_norm_conv(params["conv"], w_norm)
        return _ref_conv3x3(_nearest_up2(x), w, b)
    raise ValueError(mode)


# --------------------------------- main ---------------------------------------
if __name__ == "__main__":
    key = jax.random.PRNGKey(0)
    kx, ks, kp = jax.random.split(key, 3)

    # UpSample(c_in=8, c_out=8, w_norm=True, mode=...) called as forward(x, skip_in) with
    # x (2,4,16,16) and skip_in (2,4,16,16): channels concat to 8, output (2, 8, 32, 32).
    N, C_x, C_skip, H, W, c_out = 2, 4, 4, 16, 16, 8
    c_in = C_x + C_skip
    w_norm = True

    x = jax.random.normal(kx, (N, C_x, H, W), jnp.float32)
    skip_in = jax.random.normal(ks, (N, C_skip, H, W), jnp.float32)

    for i, mode in enumerate(("subpixel", "conv2d_t", "nearest")):
        params = init_upsample_params(jax.random.fold_in(kp, i), c_in, c_out, mode, w_norm)
        fwd = jax.jit(functools.partial(upsample_forward, mode=mode, w_norm=w_norm))
        out = jax.block_until_ready(fwd(params, x, skip_in))
        ref = _ref_upsample(params, x, skip_in, mode=mode, w_norm=w_norm)
        assert out.shape == (N, c_out, 2 * H, 2 * W), (mode, out.shape)
        # bf16 MXU operands / bf16 conv raster with f32 accumulation -> bounded mismatch.
        assert jnp.allclose(out, ref, atol=5e-2, rtol=5e-2), (
            mode, float(jnp.max(jnp.abs(out - ref))))

    # batch == 1 exercises the row-tiled grid (second "parallel" axis keeps both v7x
    # TensorCores busy when the batch axis alone cannot).
    params1 = init_upsample_params(jax.random.fold_in(kp, 1), c_in, c_out, "conv2d_t", w_norm)
    fwd1 = jax.jit(functools.partial(upsample_forward, mode="conv2d_t", w_norm=w_norm))
    out1 = jax.block_until_ready(fwd1(params1, x[:1], skip_in[:1]))
    ref1 = _ref_upsample(params1, x[:1], skip_in[:1], mode="conv2d_t", w_norm=w_norm)
    assert out1.shape == (1, c_out, 2 * H, 2 * W)
    assert jnp.allclose(out1, ref1, atol=5e-2, rtol=5e-2), float(jnp.max(jnp.abs(out1 - ref1)))

    print("KERNEL_OK")
</pallas_src>

<mosaic_0001>
module attributes {stable_mosaic.version = 11 : i64} {
  func.func @_conv3x3_kernel(%arg0: i32, %arg1: i32, %arg2: memref<1x1x8x342xbf16, #tpu.memory_space<vmem>>, %arg3: memref<32x72xbf16, #tpu.memory_space<vmem>>, %arg4: memref<32x1xf32, #tpu.memory_space<vmem>>, %arg5: memref<1x1x32x288xbf16, #tpu.memory_space<vmem>>, %arg6: memref<72x288xbf16, #tpu.memory_space<vmem>>) attributes {dimension_semantics = [#tpu.dimension_semantics<parallel>, #tpu.dimension_semantics<parallel>], iteration_bounds = array<i64: 2, 1>, scalar_prefetch = 0 : i64, scratch_operands = 1 : i64, tpu.core_type = #tpu.core_type<tc>, window_params = [{transform_indices = @transform_0, window_bounds = array<i64: 1, 1, 8, 342>}, {pipeline_mode = #tpu.pipeline_mode<synchronous>, transform_indices = @transform_1, window_bounds = array<i64: 32, 72>}, {pipeline_mode = #tpu.pipeline_mode<synchronous>, transform_indices = @transform_2, window_bounds = array<i64: 32, 1>}, {transform_indices = @transform_3, window_bounds = array<i64: 1, 1, 32, 288>}]} {
    %c0 = arith.constant 0 : index
    %c0_0 = arith.constant 0 : index
    %c0_1 = arith.constant 0 : index
    %c0_2 = arith.constant 0 : index
    %0 = vector.load %arg2[%c0, %c0_0, %c0_1, %c0_2] : memref<1x1x8x342xbf16, #tpu.memory_space<vmem>>, vector<1x1x8x288xbf16>
    %1 = vector.shape_cast %0 : vector<1x1x8x288xbf16> to vector<8x288xbf16>
    %c0_3 = arith.constant 0 : index
    %c0_4 = arith.constant 0 : index
    %2 = vector.load %arg6[%c0_3, %c0_4] : memref<72x288xbf16, #tpu.memory_space<vmem>>, vector<8x288xbf16>
    tpu.vector_store %arg6[%c0_3, %c0_4], %1 {strides = array<i32>} : memref<72x288xbf16, #tpu.memory_space<vmem>>, vector<8x288xbf16>,
    %c0_5 = arith.constant 0 : index
    %c0_6 = arith.constant 0 : index
    %c0_7 = arith.constant 0 : index
    %c1 = arith.constant 1 : index
    %3 = vector.load %arg2[%c0_5, %c0_6, %c0_7, %c1] : memref<1x1x8x342xbf16, #tpu.memory_space<vmem>>, vector<1x1x8x288xbf16>
    %4 = vector.shape_cast %3 : vector<1x1x8x288xbf16> to vector<8x288xbf16>
    %c8 = arith.constant 8 : index
    %c0_8 = arith.constant 0 : index
    %5 = vector.load %arg6[%c8, %c0_8] : memref<72x288xbf16, #tpu.memory_space<vmem>>, vector<8x288xbf16>
    tpu.vector_store %arg6[%c8, %c0_8], %4 {strides = array<i32>} : memref<72x288xbf16, #tpu.memory_space<vmem>>, vector<8x288xbf16>,
    %c0_9 = arith.constant 0 : index
    %c0_10 = arith.constant 0 : index
    %c0_11 = arith.constant 0 : index
    %c2 = arith.constant 2 : index
    %6 = vector.load %arg2[%c0_9, %c0_10, %c0_11, %c2] : memref<1x1x8x342xbf16, #tpu.memory_space<vmem>>, vector<1x1x8x288xbf16>
    %7 = vector.shape_cast %6 : vector<1x1x8x288xbf16> to vector<8x288xbf16>
    %c16 = arith.constant 16 : index
    %c0_12 = arith.constant 0 : index
    %8 = vector.load %arg6[%c16, %c0_12] : memref<72x288xbf16, #tpu.memory_space<vmem>>, vector<8x288xbf16>
    tpu.vector_store %arg6[%c16, %c0_12], %7 {strides = array<i32>} : memref<72x288xbf16, #tpu.memory_space<vmem>>, vector<8x288xbf16>,
    %c0_13 = arith.constant 0 : index
    %c0_14 = arith.constant 0 : index
    %c0_15 = arith.constant 0 : index
    %c18 = arith.constant 18 : index
    %9 = vector.load %arg2[%c0_13, %c0_14, %c0_15, %c18] : memref<1x1x8x342xbf16, #tpu.memory_space<vmem>>, vector<1x1x8x288xbf16>
    %10 = vector.shape_cast %9 : vector<1x1x8x288xbf16> to vector<8x288xbf16>
    %c24 = arith.constant 24 : index
    %c0_16 = arith.constant 0 : index
    %11 = vector.load %arg6[%c24, %c0_16] : memref<72x288xbf16, #tpu.memory_space<vmem>>, vector<8x288xbf16>
    tpu.vector_store %arg6[%c24, %c0_16], %10 {strides = array<i32>} : memref<72x288xbf16, #tpu.memory_space<vmem>>, vector<8x288xbf16>,
    %c0_17 = arith.constant 0 : index
    %c0_18 = arith.constant 0 : index
    %c0_19 = arith.constant 0 : index
    %c19 = arith.constant 19 : index
    %12 = vector.load %arg2[%c0_17, %c0_18, %c0_19, %c19] : memref<1x1x8x342xbf16, #tpu.memory_space<vmem>>, vector<1x1x8x288xbf16>
    %13 = vector.shape_cast %12 : vector<1x1x8x288xbf16> to vector<8x288xbf16>
    %c32 = arith.constant 32 : index
    %c0_20 = arith.constant 0 : index
    %14 = vector.load %arg6[%c32, %c0_20] : memref<72x288xbf16, #tpu.memory_space<vmem>>, vector<8x288xbf16>
    tpu.vector_store %arg6[%c32, %c0_20], %13 {strides = array<i32>} : memref<72x288xbf16, #tpu.memory_space<vmem>>, vector<8x288xbf16>,
    %c0_21 = arith.constant 0 : index
    %c0_22 = arith.constant 0 : index
    %c0_23 = arith.constant 0 : index
    %c20 = arith.constant 20 : index
    %15 = vector.load %arg2[%c0_21, %c0_22, %c0_23, %c20] : memref<1x1x8x342xbf16, #tpu.memory_space<vmem>>, vector<1x1x8x288xbf16>
    %16 = vector.shape_cast %15 : vector<1x1x8x288xbf16> to vector<8x288xbf16>
    %c40 = arith.constant 40 : index
    %c0_24 = arith.constant 0 : index
    %17 = vector.load %arg6[%c40, %c0_24] : memref<72x288xbf16, #tpu.memory_space<vmem>>, vector<8x288xbf16>
    tpu.vector_store %arg6[%c40, %c0_24], %16 {strides = array<i32>} : memref<72x288xbf16, #tpu.memory_space<vmem>>, vector<8x288xbf16>,
    %c0_25 = arith.constant 0 : index
    %c0_26 = arith.constant 0 : index
    %c0_27 = arith.constant 0 : index
    %c36 = arith.constant 36 : index
    %18 = vector.load %arg2[%c0_25, %c0_26, %c0_27, %c36] : memref<1x1x8x342xbf16, #tpu.memory_space<vmem>>, vector<1x1x8x288xbf16>
    %19 = vector.shape_cast %18 : vector<1x1x8x288xbf16> to vector<8x288xbf16>
    %c48 = arith.constant 48 : index
    %c0_28 = arith.constant 0 : index
    %20 = vector.load %arg6[%c48, %c0_28] : memref<72x288xbf16, #tpu.memory_space<vmem>>, vector<8x288xbf16>
    tpu.vector_store %arg6[%c48, %c0_28], %19 {strides = array<i32>} : memref<72x288xbf16, #tpu.memory_space<vmem>>, vector<8x288xbf16>,
    %c0_29 = arith.constant 0 : index
    %c0_30 = arith.constant 0 : index
    %c0_31 = arith.constant 0 : index
    %c37 = arith.constant 37 : index
    %21 = vector.load %arg2[%c0_29, %c0_30, %c0_31, %c37] : memref<1x1x8x342xbf16, #tpu.memory_space<vmem>>, vector<1x1x8x288xbf16>
    %22 = vector.shape_cast %21 : vector<1x1x8x288xbf16> to vector<8x288xbf16>
    %c56 = arith.constant 56 : index
    %c0_32 = arith.constant 0 : index
    %23 = vector.load %arg6[%c56, %c0_32] : memref<72x288xbf16, #tpu.memory_space<vmem>>, vector<8x288xbf16>
    tpu.vector_store %arg6[%c56, %c0_32], %22 {strides = array<i32>} : memref<72x288xbf16, #tpu.memory_space<vmem>>, vector<8x288xbf16>,
    %c0_33 = arith.constant 0 : index
    %c0_34 = arith.constant 0 : index
    %c0_35 = arith.constant 0 : index
    %c38 = arith.constant 38 : index
    %24 = vector.load %arg2[%c0_33, %c0_34, %c0_35, %c38] : memref<1x1x8x342xbf16, #tpu.memory_space<vmem>>, vector<1x1x8x288xbf16>
    %25 = vector.shape_cast %24 : vector<1x1x8x288xbf16> to vector<8x288xbf16>
    %c64 = arith.constant 64 : index
    %c0_36 = arith.constant 0 : index
    %26 = vector.load %arg6[%c64, %c0_36] : memref<72x288xbf16, #tpu.memory_space<vmem>>, vector<8x288xbf16>
    tpu.vector_store %arg6[%c64, %c0_36], %25 {strides = array<i32>} : memref<72x288xbf16, #tpu.memory_space<vmem>>, vector<8x288xbf16>,
    %c0_37 = arith.constant 0 : index
    %c0_38 = arith.constant 0 : index
    %27 = vector.load %arg3[%c0_37, %c0_38] : memref<32x72xbf16, #tpu.memory_space<vmem>>, vector<32x72xbf16>
    %c0_39 = arith.constant 0 : index
    %c0_40 = arith.constant 0 : index
    %28 = vector.load %arg6[%c0_39, %c0_40] : memref<72x288xbf16, #tpu.memory_space<vmem>>, vector<72x288xbf16>
    %cst = arith.constant dense<0.000000e+00> : vector<32x288xf32>
    %29 = tpu.matmul %27, %28, %cst {dimension_numbers = #tpu.dot_dimension_numbers<[1], [0], [0], [1], [0, 0, 1, 1], [], []>} : vector<32x72xbf16>, vector<72x288xbf16>, vector<32x288xf32> -> vector<32x288xf32>
    %c0_41 = arith.constant 0 : index
    %c0_42 = arith.constant 0 : index
    %30 = vector.load %arg4[%c0_41, %c0_42] : memref<32x1xf32, #tpu.memory_space<vmem>>, vector<32x1xf32>
    %31 = vector.broadcast %30 : vector<32x1xf32> to vector<32x288xf32>
    %32 = arith.addf %29, %31 : vector<32x288xf32>
    %33 = arith.truncf %32 : vector<32x288xf32> to vector<32x288xbf16>
    %c0_43 = arith.constant 0 : index
    %c0_44 = arith.constant 0 : index
    %c0_45 = arith.constant 0 : index
    %c0_46 = arith.constant 0 : index
    %34 = vector.load %arg5[%c0_43, %c0_44, %c0_45, %c0_46] : memref<1x1x32x288xbf16, #tpu.memory_space<vmem>>, vector<1x1x32x288xbf16>
    %35 = vector.shape_cast %34 : vector<1x1x32x288xbf16> to vector<32x288xbf16>
    %36 = vector.shape_cast %33 : vector<32x288xbf16> to vector<1x1x32x288xbf16>
    tpu.vector_store %arg5[%c0_43, %c0_44, %c0_45, %c0_46], %36 {strides = array<i32>} : memref<1x1x32x288xbf16, #tpu.memory_space<vmem>>, vector<1x1x32x288xbf16>,
    return
  }
  func.func @transform_0(%arg0: i32, %arg1: i32) -> (i32, i32, i32, i32) {
    %c0_i32 = arith.constant 0 : i32
    %c0_i32_0 = arith.constant 0 : i32
    %c0_i32_1 = arith.constant 0 : i32
    return %arg0, %arg1, %c0_i32, %c0_i32_0 : i32, i32, i32, i32
  }
  func.func @transform_1(%arg0: i32, %arg1: i32) -> (i32, i32) {
    %c0_i32 = arith.constant 0 : i32
    %c0_i32_0 = arith.constant 0 : i32
    %c0_i32_1 = arith.constant 0 : i32
    return %c0_i32, %c0_i32_0 : i32, i32
  }
  func.func @transform_2(%arg0: i32, %arg1: i32) -> (i32, i32) {
    %c0_i32 = arith.constant 0 : i32
    %c0_i32_0 = arith.constant 0 : i32
    %c0_i32_1 = arith.constant 0 : i32
    return %c0_i32, %c0_i32_0 : i32, i32
  }
  func.func @transform_3(%arg0: i32, %arg1: i32) -> (i32, i32, i32, i32) {
    %c0_i32 = arith.constant 0 : i32
    %c0_i32_0 = arith.constant 0 : i32
    %c0_i32_1 = arith.constant 0 : i32
    return %arg0, %arg1, %c0_i32, %c0_i32_0 : i32, i32, i32, i32
  }
}

</mosaic_0001>

<bundles_post_ra>
// kernel: upsample_forward.1
= control target key start
LH: loop header
LB: loop body
LE: loop exit
PB: predicated region body
PF: predicated region fallthrough
CT: control target
= control target key end

     0   :  { %s841_s12 = smov 0   ;;  %s843_s13 = smov 0   ;;  %s957_s0 = inlined_call_operand.vmem [shape: bf16[2,1,8,342], index: 0, kind: input, shape index: {}]   ;;  %s958_s1 = inlined_call_operand.vmem [shape: bf16[32,72], index: 1, kind: input, shape index: {}]   ;;  %s959_s2 = inlined_call_operand.vmem [shape: f32[32,1], index: 2, kind: input, shape index: {}]   ;;  %s960_s3 = inlined_call_operand.vmem [shape: bf16[2,1,32,288], index: 3, kind: output, shape index: {}]  }
   0x1   :  { %s845_s14 = smov 0  }
   0x2 LB: > { %s25_s15 = sadd.s32 1, %s806_s13  ;;  %p664_p0 = scmp.ge.s32.totalorder %s810_s14, 1  ;;  %s810_s14 = sphi %s845_s14, %s13_s14   ;;  %s806_s13 = sphi %s843_s13, %s962_s13   ;;  %s802_s12 = sphi %s841_s12, %s961_s12  }
   0x3   : > { %p27_p1 = scmp.ge.s32.totalorder %s25_s15, 2  ;;  %p157_p2 = scmp.lt.s32.totalorder %s810_s14, 3 }
   0x5   : > { %s964_s15 = smov (%p27_p1, %s25_s15), 0  ;;  %p158_p3 = pnand %p664_p0, %p157_p2 }
   0x6   : > { %p189_p4 = scmp.lt.s32.totalorder (!%p158_p3), %s802_s12, 1  ;;  %s812_s20 = smov (!%p158_p3), 90  }
   0x7   : > { %161 = sbr.rel (%p158_p3) target bundleno = 345 (0x159), region = 32  ;;  %s813_s21 = smov (!%p158_p3), 92  }
   0x8   : > { %s814_s22 = smov (!%p158_p3), 91   ;;  %s815_s23 = smov (!%p158_p3), 108  }
   0x9   : > { %s816_s24 = smov (!%p158_p3), 109   ;;  %s817_s25 = smov (!%p158_p3), 126  }
   0xa   : > { %s818_s26 = smov (!%p158_p3), 110   ;;  %s819_s27 = smov (!%p158_p3), 127  }
   0xc   : > { %s966_s12 = smov (!%p189_p4, %s802_s12), 1  ;;  %vm211_vm0 = vcmask 257024   ;;  %vm223_vm1 = vcmask 1043456   ;;  %vm310_vm2 = vcmask 752640   ;;  %vm344_vm3 = vcmask 736256  }
   0xd   : > { %s750_s16 = smul.u32 12, %s966_s12  ;;  %vm327_vm4 = vcmask 744448   ;;  %vm276_vm5 = vcmask 891904   ;;  %vm293_vm6 = vcmask 883712   ;;  %vm259_vm7 = vcmask 900096  }
   0xe   : > { %vm242_vm8 = vcmask 1031168   ;;  %vm478_vm9 = vcmask 588800   ;;  %vm225_vm10 = vcmask 1039360   ;;  %s751_s17 = smul.u32 48, %s966_s12 }
   0xf   : > { %s865_s19 = scalar_lea.vmem %s957_s0, %s750_s16 }
  0x10   : > { %v334_v0 = vld [vmem:[%s865_s19 + $0x8] sm:$0xf]  ;;  %v333_v2 = vld [vmem:[%s865_s19] sm:$0xff] }
  0x11   : > { %v300_v1 = vld [vmem:[%s865_s19 + $0x8] sm:$0xf]  ;;  %339 = vrot.lane.b32.xlu0 %v334_v0, %s812_s20  ;;  %210 = vst [vmem:[#allocation2] sm:$0xff] %v333_v2  ;;  %303 = vrot.lane.b32.xlu2 %v333_v2, %s813_s21  ;;  %v372_v0 = vld [vmem:[%s959_s2] sm:$0xff] }
  0x12   : > { %305 = vrot.lane.b32.xlu1 %v300_v1, %s813_s21  ;;  %v317_v3 = vld [vmem:[%s865_s19 + $0x8] sm:$0xf] }
  0x13   : > { %v283_v4 = vld [vmem:[%s865_s19 + $0x8] sm:$0xf] }
  0x14   : > { %v266_v5 = vld [vmem:[%s865_s19 + $0x8] sm:$0xf] }
  0x15   : > { %v232_v6 = vld [vmem:[%s865_s19 + $0x8] sm:$0xf] }
  0x16   : > { %v249_v7 = vld [vmem:[%s865_s19 + $0x8] sm:$0xf] }
  0x17   : > { %v214_v8 = vld [vmem:[%s865_s19 + $0x8] sm:$0xf] }
  0x18   : > { %v209_v17 = vld [vmem:[%s865_s19 + $0x8] sm:$0xf] }
  0x19   : > { %337 = vrot.lane.b32.xlu0 %v333_v2, %s812_s20  ;;  %320 = vrot.lane.b32.xlu2 %v333_v2, %s814_s22  ;;  %212 = vst.msk [vmem:[#allocation2 + $0x8] sm:$0xf] %vm211_vm0, %v209_v17  ;;  %s934_s20 = scalar_lea.vmem %s960_s3, %s751_s17 }
  0x1a   : > { %322 = vrot.lane.b32.xlu1 %v317_v3, %s814_s22 }
  0x21   : > { %271 = vrot.lane.b32.xlu0 %v266_v5, %s816_s24  ;;  %269 = vrot.lane.b32.xlu2 %v333_v2, %s816_s24 }
  0x22   : > { %288 = vrot.lane.b32.xlu1 %v283_v4, %s815_s23 }
  0x29   : > { %286 = vrot.lane.b32.xlu0 %v333_v2, %s815_s23  ;;  %254 = vrot.lane.b32.xlu2 %v249_v7, %s818_s26 }
  0x2a   : > { %237 = vrot.lane.b32.xlu1 %v232_v6, %s817_s25 }
  0x31   : > { %235 = vrot.lane.b32.xlu0 %v333_v2, %s817_s25  ;;  %219 = vrot.lane.b32.xlu2 %v214_v8, %s819_s27  ;;  %v685_v8 = vld [vmem:[#allocation2 + $0x8] sm:$0xf] }
  0x32   : > { %252 = vrot.lane.b32.xlu1 %v333_v2, %s818_s26 }
  0x39   : > { %217 = vrot.lane.b32.xlu0 %v333_v2, %s819_s27  ;;  %v820_v2 = vmov 0  }
  0x3a   : > { %785 = vset.pattern.permute.xlu1 %v820_v2  ;;  %787 = vset.pattern.permute.xlu0 %v820_v2 }
  0x3b   : > { %378 = vperm.xlu1 %785, %v372_v0   ;;  %786 = vset.pattern.permute.xlu2 %v820_v2 }
  0x6b   : > { %v304_v9 = vpop.permute.xlu2 %303 }
  0x6c   : > { %v307_v12 = vrot.slane %v304_v9, 4 }
  0x73   : > { %v321_v10 = vpop.permute.xlu2 %320 }
  0x74   : > { %v324_v20 = vrot.slane %v321_v10, 4 }
  0x7b   : > { %v270_v11 = vpop.permute.xlu2 %269 }
  0x7c   : > { %v273_v37 = vrot.slane %v270_v11, 4 }
  0x83   : > { %v340_v13 = vpop.permute.xlu0 %339  ;;  %v877_v16 = vpop.permute.xlu2 %254 }
  0x84   : > { %v306_v14 = vpop.permute.xlu1 %305  ;;  %349 = vst.msk [vmem:[#allocation2 + $0x68] sm:$0xf] %vm211_vm0, %v340_v13  ;;  %v342_v24 = vrot.slane %v340_v13, 4  ;;  %v257_v4 = vrot.slane %v877_v16, 4 }
  0x85   : > { %v308_v15 = vrot.slane %v306_v14, 4  ;;  %315 = vst.msk [vmem:[#allocation2 + $0x50] sm:$0xf] %vm211_vm0, %v306_v14 }
  0x86   : > { %264 = vst.msk [vmem:[#allocation2 + $0x2c] sm:$0xf] %vm211_vm0, %v877_v16 }
  0x87   : > { %v309_v18 = vsel %vm223_vm1, %v307_v12, %v308_v15 }
  0x88   : > { %v311_v19 = vsel %vm310_vm2, %v304_v9, %v309_v18 }
  0x89   : > { %314 = vst [vmem:[#allocation2 + $0x48] sm:$0xff] %v311_v19 }
  0x8b   : > { %v338_v21 = vpop.permute.xlu0 %337  ;;  %v371_v23 = vld [vmem:[#allocation2 + $0x68] sm:$0xf]  ;;  %v886_v28 = vpop.permute.xlu2 %219 }
  0x8c   : > { %v323_v22 = vpop.permute.xlu1 %322  ;;  %v341_v25 = vrot.slane %v338_v21, 4  ;;  %v450_v27 = vunpack.c.l.b16 %v371_v23  ;;  %230 = vst.msk [vmem:[#allocation2 + $0x14] sm:$0xf] %vm211_vm0, %v886_v28  ;;  %v721_v42 = vld [vmem:[#allocation2 + $0x50] sm:$0xf] }
  0x8d   : > { %v325_v26 = vrot.slane %v323_v22, 4  ;;  %332 = vst.msk [vmem:[#allocation2 + $0x5c] sm:$0xf] %vm211_vm0, %v323_v22  ;;  %v738_v3 = vld [vmem:[#allocation2 + $0x28] sm:$0xf0] }
  0x8e   : > { %v343_v29 = vsel %vm223_vm1, %v341_v25, %v342_v24  ;;  %v465_v31 = vpack.c.b16 %v450_v27, %v450_v27  ;;  %v731_v25 = vld [vmem:[%s958_s1] sm:$0xff]  ;;  %v222_v27 = vrot.slane %v886_v28, 4 }
  0x8f   : > { %v326_v30 = vsel %vm223_vm1, %v324_v20, %v325_v26  ;;  %v345_v32 = vsel %vm344_vm3, %v338_v21, %v343_v29 }
  0x90   : > { %v328_v33 = vsel %vm327_vm4, %v321_v10, %v326_v30  ;;  %v493_v34 = vsel %vm223_vm1, %v465_v31, 0  ;;  %v448_v35 = vunpack.c.l.b16 %v345_v32  ;;  %v449_v36 = vunpack.c.h.b16 %v345_v32  ;;  %v713_v50 = vld [vmem:[#allocation2 + $0x48] sm:$0xf]  ;;  %v742_v51 = vld [vmem:[#allocation2 + $0x4c] sm:$0xf]  ;;  %v375_v31 = vld [vmem:[%s959_s2 + $0x18] sm:$0xff] }
  0x91   : > { %331 = vst [vmem:[#allocation2 + $0x54] sm:$0xff] %v328_v33  ;;  %536 = vmatpush.bf16.msra.mxu2 %v493_v34  ;;  %v374_v32 = vld [vmem:[%s959_s2 + $0x10] sm:$0xff]  ;;  %v373_v33 = vld [vmem:[%s959_s2 + $0x8] sm:$0xff]  ;;  %393 = vperm.xlu1 %785, %v375_v31  }
  0x92   : > { %v463_v38 = vpack.c.b16 %v448_v35, %v448_v35  ;;  %v464_v39 = vpack.c.b16 %v449_v36, %v449_v36  ;;  %388 = vperm.xlu0 %787, %v374_v32   ;;  %383 = vperm.xlu2 %786, %v373_v33  }
  0x93   : > { %v272_v41 = vpop.permute.xlu0 %271  ;;  %v735_v13 = vld [vmem:[#allocation2 + $0x10] sm:$0xf0] }
  0x94   : > { %v289_v40 = vpop.permute.xlu1 %288  ;;  %v744_v43 = vld [vmem:[#allocation2 + $0x58] sm:$0xf0]  ;;  %v274_v44 = vrot.slane %v272_v41, 4  ;;  %v487_v46 = vsel %vm223_vm1, %v463_v38, 0  ;;  %281 = vst.msk [vmem:[#allocation2 + $0x38] sm:$0xf] %vm211_vm0, %v272_v41  ;;  %v686_v22 = vor.u32 %v735_v13, %v685_v8 }
  0x95   : > { %298 = vst.msk [vmem:[#allocation2 + $0x44] sm:$0xf] %vm211_vm0, %v289_v40  ;;  %v722_v45 = vor.u32 %v744_v43, %v721_v42  ;;  %498 = vmatpush.bf16.msra.mxu0 %v487_v46  ;;  %745 = vmatpush.bf16.msra.mxu3 %v487_v46  ;;  %v490_v47 = vsel %vm223_vm1, %v464_v39, 0  ;;  %v291_v59 = vrot.slane %v289_v40, 4  ;;  %v677_v40 = vld [vmem:[#allocation2] sm:$0xf] }
  0x96   : > { %v275_v48 = vsel %vm223_vm1, %v273_v37, %v274_v44  ;;  %517 = vmatpush.bf16.msra.mxu1 %v490_v47  ;;  %v733_v41 = vld [vmem:[#allocation2 + $0x4] sm:$0xf]  ;;  %v732_v46 = vld [vmem:[%s958_s1 + $0x8] sm:$0xff] }
  0x97   : > { %537 = vmatpush.bf16.msra.mxu2 %v722_v45  ;;  %v277_v49 = vsel %vm276_vm5, %v270_v11, %v275_v48 }
  0x98   : > { %280 = vst [vmem:[#allocation2 + $0x30] sm:$0xff] %v277_v49  ;;  %v743_v52 = vld [vmem:[#allocation2 + $0x50] sm:$0xf0]  ;;  %v715_v53 = vld [vmem:[#allocation2 + $0x54] sm:$0xf0] }
  0x99   : > { %v714_v54 = vor.u32 %v743_v52, %v713_v50  ;;  %v718_v55 = vor.u32 %v742_v51, %v715_v53 }
  0x9b   : > { %v287_v56 = vpop.permute.xlu0 %286  ;;  %499 = vmatpush.bf16.msra.mxu0 %v714_v54  ;;  %746 = vmatpush.bf16.msra.mxu3 %v714_v54  ;;  %v709_v61 = vld [vmem:[#allocation2 + $0x38] sm:$0xf] }
  0x9c   : > { %v238_v57 = vpop.permute.xlu1 %237  ;;  %v741_v58 = vld [vmem:[#allocation2 + $0x40] sm:$0xf0]  ;;  %v290_v60 = vrot.slane %v287_v56, 4  ;;  %518 = vmatpush.bf16.msra.mxu1 %v718_v55 }
  0x9d   : > { %247 = vst.msk [vmem:[#allocation2 + $0x20] sm:$0xf] %vm211_vm0, %v238_v57  ;;  %v710_v62 = vor.u32 %v741_v58, %v709_v61  ;;  %v240_v9 = vrot.slane %v238_v57, 4 }
  0x9e   : > { %v292_v63 = vsel %vm223_vm1, %v290_v60, %v291_v59 }
  0x9f   : > { %v294_v1 = vsel %vm293_vm6, %v287_v56, %v292_v63  ;;  %538 = vmatpush.bf16.msra.mxu2 %v710_v62  ;;  %v701_v17 = vld [vmem:[#allocation2 + $0x30] sm:$0xf]  ;;  %v739_v20 = vld [vmem:[#allocation2 + $0x34] sm:$0xf] }
  0xa0   : > { %297 = vst [vmem:[#allocation2 + $0x3c] sm:$0xff] %v294_v1 }
  0xa3   : > { %v236_v6 = vpop.permute.xlu0 %235 }
  0xa4   : > { %v253_v5 = vpop.permute.xlu1 %252  ;;  %v697_v7 = vld [vmem:[#allocation2 + $0x20] sm:$0xf]  ;;  %v239_v11 = vrot.slane %v236_v6, 4 }
  0xa5   : > { %v256_v10 = vrot.slane %v253_v5, 4  ;;  %v698_v12 = vor.u32 %v738_v3, %v697_v7 }
  0xa6   : > { %v241_v15 = vsel %vm223_vm1, %v239_v11, %v240_v9 }
  0xa7   : > { %v258_v14 = vsel %vm223_vm1, %v256_v10, %v257_v4  ;;  %539 = vmatpush.bf16.msra.mxu2 %v698_v12  ;;  %v243_v19 = vsel %vm242_vm8, %v236_v6, %v241_v15  ;;  %v740_v16 = vld [vmem:[#allocation2 + $0x38] sm:$0xf0]  ;;  %v703_v21 = vld [vmem:[#allocation2 + $0x3c] sm:$0xf0] }
  0xa8   : > { %v260_v18 = vsel %vm259_vm7, %v253_v5, %v258_v14  ;;  %v702_v23 = vor.u32 %v740_v16, %v701_v17  ;;  %v706_v24 = vor.u32 %v739_v20, %v703_v21  ;;  %246 = vst [vmem:[#allocation2 + $0x18] sm:$0xff] %v243_v19 }
  0xa9   : > { %263 = vst [vmem:[#allocation2 + $0x24] sm:$0xff] %v260_v18 }
  0xaa   : > { %500 = vmatpush.bf16.msra.mxu0 %v702_v23  ;;  %747 = vmatpush.bf16.msra.mxu3 %v702_v23 }
  0xab   : > { %519 = vmatpush.bf16.msra.mxu1 %v706_v24  ;;  %v218_v26 = vpop.permute.xlu0 %217  ;;  %540 = vmatpush.bf16.msra.mxu2 %v686_v22 }
  0xac   : > { %v221_v29 = vrot.slane %v218_v26, 4 }
  0xad   : > { %v379_v47 = vpop.permute.xlu1 %378 }
  0xae   : > { %v224_v30 = vsel %vm223_vm1, %v221_v29, %v222_v27  ;;  %727 = vmatmul.msk.bf16.vlgmr.msra.gmra.mxu2 %vm478_vm9, %v731_v25 }
  0xaf   : > { %v226_v34 = vsel %vm225_vm10, %v218_v26, %v224_v30  ;;  %v689_v36 = vld [vmem:[#allocation2 + $0x18] sm:$0xf]  ;;  %v736_v37 = vld [vmem:[#allocation2 + $0x1c] sm:$0xf] }
  0xb0   : > { %v737_v28 = vld [vmem:[#allocation2 + $0x20] sm:$0xf0]  ;;  %v691_v35 = vld [vmem:[#allocation2 + $0x24] sm:$0xf0]  ;;  %229 = vst [vmem:[#allocation2 + $0xc] sm:$0xff] %v226_v34 }
  0xb1   : > { %v690_v38 = vor.u32 %v737_v28, %v689_v36  ;;  %v694_v39 = vor.u32 %v736_v37, %v691_v35 }
  0xb3   : > { %501 = vmatpush.bf16.msra.mxu0 %v690_v38  ;;  %748 = vmatpush.bf16.msra.mxu3 %v690_v38 }
  0xb4   : > { %520 = vmatpush.bf16.msra.mxu1 %v694_v39 }
  0xb7   : > { %v734_v42 = vld [vmem:[#allocation2 + $0x8] sm:$0xf0]  ;;  %v679_v43 = vld [vmem:[#allocation2 + $0xc] sm:$0xf0] }
  0xb8   : > { %v678_v44 = vor.u32 %v734_v42, %v677_v40  ;;  %v682_v45 = vor.u32 %v733_v41, %v679_v43 }
  0xba   : > { %502 = vmatpush.bf16.msra.mxu0 %v678_v44  ;;  %749 = vmatpush.bf16.msra.mxu3 %v678_v44 }
  0xbb   : > { %521 = vmatpush.bf16.msra.mxu1 %v682_v45 }
  0xbd   : > { %723 = vmatmul.msk.bf16.vlgmr.msra.gmra.mxu0 %vm478_vm9, %v731_v25  ;;  %724 = vmatmul.msk.bf16.vlgmr.msra.gmra.mxu3 %vm478_vm9, %v732_v46 }
  0xbe   : > { %725 = vmatmul.msk.bf16.vlgmr.msra.gmra.mxu1 %vm478_vm9, %v731_v25  ;;  %728 = vmatmul.msk.bf16.gmra.mxu2 %vm478_vm9, %v732_v46 }
  0xce   : > { %726 = vmatmul.msk.bf16.gmra.mxu1 %vm478_vm9, %v732_v46 }
  0xec   : > { %v384_v51 = vpop.permute.xlu2 %383 }
 0x103   : > { %v394_v6 = vpop.permute.xlu1 %393 }
 0x104   : > { %v389_v60 = vpop.permute.xlu0 %388 }
 0x131   : > { %v542_v48 = vpop.f32.mrf.mxu2 }
 0x132   : > { %v543_v49 = vadd.f32 %v542_v48, %v379_v47 }
 0x134   : > { %v553_v50 = vpack.c.bf16 %v543_v49, %v543_v49 }
 0x136   : > { %561 = vst.msk [vmem:[%s934_s20 + $0x8] sm:$0xf] %vm211_vm0, %v553_v50 }
 0x139   : > { %v544_v52 = vpop.f32.mrf.mxu2 }
 0x13a   : > { %v504_v53 = vpop.f32.mrf.mxu0  ;;  %v545_v54 = vadd.f32 %v544_v52, %v384_v51 }
 0x13b   : > { %v505_v55 = vadd.f32 %v504_v53, %v379_v47  ;;  %v523_v56 = vpop.f32.mrf.mxu1 }
 0x13c   : > { %v524_v57 = vadd.f32 %v523_v56, %v379_v47  ;;  %v555_v58 = vpack.c.bf16 %v545_v54, %v545_v54 }
 0x13e   : > { %v552_v59 = vpack.c.bf16 %v524_v57, %v505_v55  ;;  %563 = vst.msk [vmem:[%s934_s20 + $0x14] sm:$0xf] %vm211_vm0, %v555_v58 }
 0x140   : > { %560 = vst [vmem:[%s934_s20] sm:$0xff] %v552_v59  ;;  %v509_v5 = vpop.f32.mrf.mxu3 }
 0x141   : > { %v547_v61 = vpop.f32.mrf.mxu2  ;;  %v510_v8 = vadd.f32 %v509_v5, %v389_v60 }
 0x142   : > { %v506_v62 = vpop.f32.mrf.mxu0  ;;  %v548_v63 = vadd.f32 %v547_v61, %v389_v60 }
 0x143   : > { %v507_v0 = vadd.f32 %v506_v62, %v384_v51  ;;  %v525_v1 = vpop.f32.mrf.mxu1 }
 0x144   : > { %v526_v2 = vadd.f32 %v525_v1, %v384_v51  ;;  %v557_v3 = vpack.c.bf16 %v548_v63, %v548_v63 }
 0x146   : > { %v554_v4 = vpack.c.bf16 %v526_v2, %v507_v0  ;;  %565 = vst.msk [vmem:[%s934_s20 + $0x20] sm:$0xf] %vm211_vm0, %v557_v3 }
 0x148   : > { %562 = vst [vmem:[%s934_s20 + $0xc] sm:$0xff] %v554_v4  ;;  %v511_v14 = vpop.f32.mrf.mxu3 }
 0x149   : > { %v549_v7 = vpop.f32.mrf.mxu2  ;;  %v512_v17 = vadd.f32 %v511_v14, %v394_v6 }
 0x14a   : > { %v550_v9 = vadd.f32 %v549_v7, %v394_v6 }
 0x14b   : > { %v528_v10 = vpop.f32.mrf.mxu1 }
 0x14c   : > { %v529_v11 = vadd.f32 %v528_v10, %v389_v60  ;;  %v559_v12 = vpack.c.bf16 %v550_v9, %v550_v9 }
 0x14e   : > { %v556_v13 = vpack.c.bf16 %v529_v11, %v510_v8  ;;  %567 = vst.msk [vmem:[%s934_s20 + $0x2c] sm:$0xf] %vm211_vm0, %v559_v12 }
 0x150   : > { %564 = vst [vmem:[%s934_s20 + $0x18] sm:$0xff] %v556_v13 }
 0x153   : > { %v530_v15 = vpop.f32.mrf.mxu1 }
 0x154   : > { %v531_v18 = vadd.f32 %v530_v15, %v394_v6 }
 0x156   : > { %v558_v19 = vpack.c.bf16 %v531_v18, %v512_v17 }
 0x158   : > { %566 = vst [vmem:[%s934_s20 + $0x24] sm:$0xff] %v558_v19 }
 0x159 PF: > { %s13_s14 = sadd.s32 1, %s810_s14   ;;  %s961_s12 = smov %s806_s13 }
 0x15a   : > { %p10_p5 = scmp.ge.s32.totalorder %s13_s14, 4   ;;  %s962_s13 = smov %s964_s15 }
 0x15c   :  { %12 = sbr.rel (!%p10_p5) target bundleno = 2 (0x2), region = 62 }

</bundles_post_ra>
